<compile_context>
chip_gen: v7x
topology: tpu7x:2x2x1
jax: 0.10.0
libtpu: 0.0.40
codegen_flags: <defaults>
</compile_context>

<pallas_src>
import jax
import jax.numpy as jnp
from jax.experimental import pallas as pl
from jax.experimental.pallas import tpu as pltpu

_LANE = 128


def _graph_linear_kernel(w_ref, b_ref, x_ref, o_ref):
    # w_ref: (C_out, C_in)   b_ref: (C_out, 1)
    # x_ref: (TB, C_in, TN)  o_ref: (TB, C_out, TN)
    w = w_ref[...]
    bias = b_ref[...]
    # Static (unrolled) loop over the batch tile; TB is small by construction.
    for bi in range(x_ref.shape[0]):
        acc = jnp.dot(
            w,
            x_ref[bi],
            preferred_element_type=jnp.float32,
            precision=jax.lax.Precision.HIGHEST,  # exact-f32 parity; op is mem-bound anyway
        )
        o_ref[bi] = (acc + bias).astype(o_ref.dtype)


def graph_linear(x, W, b, *, tn_max=1024):
    """x: (B, C_in, N), W: (C_out, C_in), b: (C_out,) -> (B, C_out, N)"""
    B, C_in, N = x.shape
    C_out = W.shape[0]
    itemsize = jnp.dtype(x.dtype).itemsize

    # ---- Lane (node) tile: multiple of 128 when N >= 128, else the full N ----
    # VMEM budget per step ~ 2 * TB * (C_in + C_out) * TN * itemsize (double-
    # buffered x and out tiles) + resident W, b. Keep well under the default
    # 32 MiB scoped VMEM (and v7x's 64 MiB physical VMEM).
    budget = 24 * 1024 * 1024
    per_lane = 2 * (C_in + C_out) * itemsize
    tn_cap = max(_LANE, (budget // per_lane) // _LANE * _LANE)

    if N <= _LANE:
        tn = N
    else:
        tn = min(tn_max, tn_cap, (N // _LANE) * _LANE)
        tn = max(_LANE, (tn // _LANE) * _LANE)

    # ---- Batch tile: pack batches per step when the per-batch tile is tiny ----
    x_tile_bytes = C_in * tn * itemsize
    target_tile_bytes = 2 * 1024 * 1024  # aim for ~2 MiB of x per grid step
    tb = int(max(1, min(B, target_tile_bytes // max(1, x_tile_bytes))))
    while tb > 1 and 2 * tb * (C_in + C_out) * tn * itemsize > budget:
        tb = max(1, tb // 2)

    grid = (pl.cdiv(B, tb), pl.cdiv(N, tn))
    b2d = b.reshape(C_out, 1)

    # TODO(synk): optionally cast x/W to bfloat16 (keeping f32 accumulation) to
    # halve HBM traffic when downstream accuracy allows.

    out = pl.pallas_call(
        _graph_linear_kernel,
        out_shape=jax.ShapeDtypeStruct((B, C_out, N), x.dtype),
        grid_spec=pltpu.PrefetchScalarGridSpec(
            num_scalar_prefetch=0,
            grid=grid,
            in_specs=[
                pl.BlockSpec((C_out, C_in), lambda i, j: (0, 0)),   # W, VMEM-resident
                pl.BlockSpec((C_out, 1), lambda i, j: (0, 0)),      # bias, VMEM-resident
                pl.BlockSpec((tb, C_in, tn), lambda i, j: (i, 0, j)),  # x tile
            ],
            out_specs=pl.BlockSpec((tb, C_out, tn), lambda i, j: (i, 0, j)),
        ),
        compiler_params=pltpu.CompilerParams(
            dimension_semantics=("parallel", "parallel"),  # shard across TCs (v7x: 2/chip)
        ),
    )(W, b2d, x)

    return out


def init_params(key, in_channels, out_channels):
    # Matches PyTorch reset_parameters: uniform(-stdv, stdv), stdv = 1/(in*out)
    stdv = 1.0 / (in_channels * out_channels)
    kw, kb = jax.random.split(key)
    W = jax.random.uniform(kw, (out_channels, in_channels),
                           minval=-stdv, maxval=stdv, dtype=jnp.float32)
    b = jax.random.uniform(kb, (out_channels,),
                           minval=-stdv, maxval=stdv, dtype=jnp.float32)
    return W, b


if __name__ == "__main__":
    key = jax.random.PRNGKey(0)
    kx, kp = jax.random.split(key)

    B, C_in, C_out, N = 2, 32, 16, 8       # small shapes: batch, in_ch, out_ch, num nodes
    x = jax.random.normal(kx, (B, C_in, N), dtype=jnp.float32)
    W, b = init_params(kp, C_in, C_out)

    out = graph_linear(x, W, b)
    out = jax.block_until_ready(out)

    # Reference check in plain JAX (same math as torch.matmul(W[None], x) + b[None,:,None])
    ref = jnp.einsum("oi,bin->bon", W, x) + b[None, :, None]
    assert out.shape == (B, C_out, N)
    assert jnp.allclose(out, ref, atol=1e-5, rtol=1e-5)

    print("KERNEL_OK")
</pallas_src>

<mosaic_0001>
module attributes {stable_mosaic.version = 11 : i64} {
  func.func @_graph_linear_kernel(%arg0: i32, %arg1: i32, %arg2: memref<16x32xf32, #tpu.memory_space<vmem>>, %arg3: memref<16x1xf32, #tpu.memory_space<vmem>>, %arg4: memref<2x32x8xf32, #tpu.memory_space<vmem>>, %arg5: memref<2x16x8xf32, #tpu.memory_space<vmem>>) attributes {dimension_semantics = [#tpu.dimension_semantics<parallel>, #tpu.dimension_semantics<parallel>], iteration_bounds = array<i64: 1, 1>, scalar_prefetch = 0 : i64, scratch_operands = 0 : i64, tpu.core_type = #tpu.core_type<tc>, window_params = [{pipeline_mode = #tpu.pipeline_mode<synchronous>, transform_indices = @transform_0, window_bounds = array<i64: 16, 32>}, {pipeline_mode = #tpu.pipeline_mode<synchronous>, transform_indices = @transform_1, window_bounds = array<i64: 16, 1>}, {transform_indices = @transform_2, window_bounds = array<i64: 2, 32, 8>}, {transform_indices = @transform_3, window_bounds = array<i64: 2, 16, 8>}]} {
    %c0 = arith.constant 0 : index
    %c0_0 = arith.constant 0 : index
    %0 = vector.load %arg2[%c0, %c0_0] : memref<16x32xf32, #tpu.memory_space<vmem>>, vector<16x32xf32>
    %c0_1 = arith.constant 0 : index
    %c0_2 = arith.constant 0 : index
    %1 = vector.load %arg3[%c0_1, %c0_2] : memref<16x1xf32, #tpu.memory_space<vmem>>, vector<16x1xf32>
    %c0_3 = arith.constant 0 : index
    %c0_4 = arith.constant 0 : index
    %c0_5 = arith.constant 0 : index
    %2 = vector.load %arg4[%c0_3, %c0_4, %c0_5] : memref<2x32x8xf32, #tpu.memory_space<vmem>>, vector<1x32x8xf32>
    %3 = vector.shape_cast %2 : vector<1x32x8xf32> to vector<32x8xf32>
    %cst = arith.constant dense<0.000000e+00> : vector<16x8xf32>
    %4 = tpu.matmul %0, %3, %cst {dimension_numbers = #tpu.dot_dimension_numbers<[1], [0], [0], [1], [0, 0, 1, 1], [], []>, precision = #tpu.contract_precision<fp32>} : vector<16x32xf32>, vector<32x8xf32>, vector<16x8xf32> -> vector<16x8xf32>
    %5 = vector.broadcast %1 : vector<16x1xf32> to vector<16x8xf32>
    %6 = arith.addf %4, %5 : vector<16x8xf32>
    %c0_6 = arith.constant 0 : index
    %c0_7 = arith.constant 0 : index
    %c0_8 = arith.constant 0 : index
    %7 = vector.load %arg5[%c0_6, %c0_7, %c0_8] : memref<2x16x8xf32, #tpu.memory_space<vmem>>, vector<1x16x8xf32>
    %8 = vector.shape_cast %7 : vector<1x16x8xf32> to vector<16x8xf32>
    %9 = vector.shape_cast %6 : vector<16x8xf32> to vector<1x16x8xf32>
    tpu.vector_store %arg5[%c0_6, %c0_7, %c0_8], %9 {strides = array<i32>} : memref<2x16x8xf32, #tpu.memory_space<vmem>>, vector<1x16x8xf32>,
    %c1 = arith.constant 1 : index
    %c0_9 = arith.constant 0 : index
    %c0_10 = arith.constant 0 : index
    %10 = vector.load %arg4[%c1, %c0_9, %c0_10] : memref<2x32x8xf32, #tpu.memory_space<vmem>>, vector<1x32x8xf32>
    %11 = vector.shape_cast %10 : vector<1x32x8xf32> to vector<32x8xf32>
    %cst_11 = arith.constant dense<0.000000e+00> : vector<16x8xf32>
    %12 = tpu.matmul %0, %11, %cst_11 {dimension_numbers = #tpu.dot_dimension_numbers<[1], [0], [0], [1], [0, 0, 1, 1], [], []>, precision = #tpu.contract_precision<fp32>} : vector<16x32xf32>, vector<32x8xf32>, vector<16x8xf32> -> vector<16x8xf32>
    %13 = vector.broadcast %1 : vector<16x1xf32> to vector<16x8xf32>
    %14 = arith.addf %12, %13 : vector<16x8xf32>
    %c1_12 = arith.constant 1 : index
    %c0_13 = arith.constant 0 : index
    %c0_14 = arith.constant 0 : index
    %15 = vector.load %arg5[%c1_12, %c0_13, %c0_14] : memref<2x16x8xf32, #tpu.memory_space<vmem>>, vector<1x16x8xf32>
    %16 = vector.shape_cast %15 : vector<1x16x8xf32> to vector<16x8xf32>
    %17 = vector.shape_cast %14 : vector<16x8xf32> to vector<1x16x8xf32>
    tpu.vector_store %arg5[%c1_12, %c0_13, %c0_14], %17 {strides = array<i32>} : memref<2x16x8xf32, #tpu.memory_space<vmem>>, vector<1x16x8xf32>,
    return
  }
  func.func @transform_0(%arg0: i32, %arg1: i32) -> (i32, i32) {
    %c0_i32 = arith.constant 0 : i32
    %c0_i32_0 = arith.constant 0 : i32
    %c0_i32_1 = arith.constant 0 : i32
    return %c0_i32, %c0_i32_0 : i32, i32
  }
  func.func @transform_1(%arg0: i32, %arg1: i32) -> (i32, i32) {
    %c0_i32 = arith.constant 0 : i32
    %c0_i32_0 = arith.constant 0 : i32
    %c0_i32_1 = arith.constant 0 : i32
    return %c0_i32, %c0_i32_0 : i32, i32
  }
  func.func @transform_2(%arg0: i32, %arg1: i32) -> (i32, i32, i32) {
    %c0_i32 = arith.constant 0 : i32
    %c0_i32_0 = arith.constant 0 : i32
    return %arg0, %c0_i32, %arg1 : i32, i32, i32
  }
  func.func @transform_3(%arg0: i32, %arg1: i32) -> (i32, i32, i32) {
    %c0_i32 = arith.constant 0 : i32
    %c0_i32_0 = arith.constant 0 : i32
    return %arg0, %c0_i32, %arg1 : i32, i32, i32
  }
}

</mosaic_0001>

<bundles_post_ra>
// kernel: tpu_custom_call.1
= control target key start
LH: loop header
LB: loop body
LE: loop exit
PB: predicated region body
PF: predicated region fallthrough
CT: control target
= control target key end

     0   :  { %vm32_vm0 = vcmask 261120   ;;  %v1442_v3 = vmov 0   ;;  %vm567_vm1 = vcmask 64512   ;;  %s1644_s2 = inlined_call_operand.vmem [shape: f32[2,32,8], index: 2, kind: input, shape index: {}]   ;;  %s1645_s0 = inlined_call_operand.vmem [shape: f32[16,32], index: 0, kind: input, shape index: {}]   ;;  %s1646_s1 = inlined_call_operand.vmem [shape: f32[16,1], index: 1, kind: input, shape index: {}]   ;;  %s1647_s3 = inlined_call_operand.vmem [shape: f32[2,16,8], index: 3, kind: output, shape index: {}]  }
   0x1   :  { %v18_v0 = vld [vmem:[%s1644_s2] sm:$0xff]  ;;  %v19_v1 = vld [vmem:[%s1644_s2 + $0x8] sm:$0xff]  ;;  %1441 = vset.pattern.permute.xlu0 %v1442_v3  ;;  %v20_v8 = vld [vmem:[%s1644_s2 + $0x10] sm:$0xff] }
   0x2   :  { %v1110_v2 = vld [vmem:[%s1644_s2 + $0x20] sm:$0xff]  ;;  %v40_v4 = vand.u32 4294901760, %v18_v0  ;;  %v43_v5 = vand.u32 4294901760, %v19_v1  ;;  %v1111_v6 = vld [vmem:[%s1644_s2 + $0x28] sm:$0xff]  ;;  %v21_v9 = vld [vmem:[%s1644_s2 + $0x18] sm:$0xff]  ;;  %v46_v11 = vand.u32 4294901760, %v20_v8 }
   0x3   :  { %v576_v7 = vand.u32 4294901760, %v1110_v2  ;;  %v579_v10 = vand.u32 4294901760, %v1111_v6  ;;  %v49_v12 = vand.u32 4294901760, %v21_v9  ;;  %v1112_v13 = vld [vmem:[%s1644_s2 + $0x30] sm:$0xff]  ;;  %v1113_v14 = vld [vmem:[%s1644_s2 + $0x38] sm:$0xff]  ;;  %v14_v15 = vld [vmem:[%s1645_s0] sm:$0xff] }
   0x4   :  { %v1490_v16 = vpack.c.bf16 %v43_v5, %v40_v4  ;;  %v582_v17 = vand.u32 4294901760, %v1112_v13  ;;  %v585_v18 = vand.u32 4294901760, %v1113_v14  ;;  %v15_v19 = vld [vmem:[%s1645_s0 + $0x8] sm:$0xff]  ;;  %v34_v20 = vsel %vm32_vm0, %v14_v15, 0  ;;  %v16_v21 = vld [vmem:[%s1646_s1] sm:$0xff] }
   0x5   :  { %v1499_v22 = vpack.c.bf16 %v579_v10, %v576_v7  ;;  %v1501_v23 = vpack.c.bf16 %v49_v12, %v46_v11  ;;  %v37_v24 = vsel %vm32_vm0, %v15_v19, 0  ;;  %v1504_v25 = vand.u32 4294901760, %v34_v20  ;;  %24 = vperm.xlu0 %1441, %v16_v21   ;;  %v17_v30 = vld [vmem:[%s1646_s1 + $0x8] sm:$0xff] }
   0x6   :  { %1321 = vmatprep.subr.bf16.mxu0 %v1490_v16  ;;  %v1507_v26 = vpack.c.bf16 %v585_v18, %v582_v17  ;;  %v1509_v27 = vand.u32 4294901760, %v37_v24  ;;  %v1511_v28 = vsub.f32 %v18_v0, %v40_v4  ;;  %v1513_v29 = vsub.f32 %v19_v1, %v43_v5 }
   0x7   :  { %1369 = vmatprep.subr.bf16.mxu1 %v1499_v22  ;;  %1323 = vmatpush3.bf16.msra.mxu0 %v1490_v16  ;;  %v1521_v31 = vsub.f32 %v34_v20, %v1504_v25  ;;  %v1523_v32 = vsub.f32 %v1110_v2, %v576_v7  ;;  %v1525_v33 = vsub.f32 %v1111_v6, %v579_v10 }
   0x8   :  { %1371 = vmatpush3.bf16.msra.mxu1 %v1499_v22  ;;  %1325 = vmatprep.subr.bf16.mxu0 %v1501_v23  ;;  %v1530_v34 = vsub.f32 %v37_v24, %v1509_v27  ;;  %v131_v35 = vand.u32 4294901760, %v1511_v28  ;;  %v138_v36 = vand.u32 4294901760, %v1513_v29  ;;  %v1534_v37 = vsub.f32 %v20_v8, %v46_v11 }
   0x9   :  { %1373 = vmatprep.subr.bf16.mxu1 %v1507_v26  ;;  %v1538_v38 = vand.u32 4294901760, %v1521_v31  ;;  %v667_v39 = vand.u32 4294901760, %v1523_v32  ;;  %v674_v40 = vand.u32 4294901760, %v1525_v33  ;;  %v1542_v41 = vsub.f32 %v21_v9, %v49_v12  ;;  %29 = vperm.xlu0 %1441, %v17_v30  }
   0xa   :  { %v1545_v42 = vand.u32 4294901760, %v1530_v34  ;;  %v132_v43 = vsub.f32 %v1511_v28, %v131_v35  ;;  %v139_v44 = vsub.f32 %v1513_v29, %v138_v36  ;;  %v145_v45 = vand.u32 4294901760, %v1534_v37 }
   0xb   :  { %1327 = vmatpush3.bf16.msra.mxu0 %v1501_v23  ;;  %v111_v46 = vsub.f32 %v1521_v31, %v1538_v38  ;;  %v668_v47 = vsub.f32 %v1523_v32, %v667_v39  ;;  %v675_v48 = vsub.f32 %v1525_v33, %v674_v40  ;;  %v152_v49 = vand.u32 4294901760, %v1542_v41 }
   0xc   :  { %1375 = vmatpush3.bf16.msra.mxu1 %v1507_v26  ;;  %v121_v50 = vsub.f32 %v1530_v34, %v1545_v42  ;;  %v133_v51 = vand.u32 4294901760, %v132_v43  ;;  %v140_v52 = vand.u32 4294901760, %v139_v44  ;;  %v146_v53 = vsub.f32 %v1534_v37, %v145_v45 }
   0xd   :  { %v112_v54 = vand.u32 4294901760, %v111_v46  ;;  %v669_v55 = vand.u32 4294901760, %v668_v47  ;;  %v676_v56 = vand.u32 4294901760, %v675_v48  ;;  %v153_v57 = vsub.f32 %v1542_v41, %v152_v49 }
   0xe   :  { %v122_v58 = vand.u32 4294901760, %v121_v50  ;;  %v1328_v59 = vpack.c.bf16 %v140_v52, %v133_v51  ;;  %v147_v60 = vand.u32 4294901760, %v146_v53  ;;  %v1573_v61 = vsub.f32 %v1112_v13, %v582_v17 }
   0xf   :  { %1196 = vmatprep.mubr.f32.mxu0 %v112_v54  ;;  %1262 = vmatprep.mubr.f32.mxu1 %v112_v54  ;;  %v1376_v62 = vpack.c.bf16 %v676_v56, %v669_v55  ;;  %v154_v63 = vand.u32 4294901760, %v153_v57  ;;  %v687_v0 = vsub.f32 %v1113_v14, %v585_v18  ;;  %v1336_v6 = vpack.c.bf16 %v1513_v29, %v1511_v28 }
  0x10   :  { %1197 = vmatmul.mubr.f32.vlgmr.msra.gmra.mrb[0].mxu0 %v122_v58  ;;  %1329 = vmatprep.subr.bf16.mxu0 %v1328_v59  ;;  %v681_v1 = vand.u32 4294901760, %v1573_v61  ;;  %v1384_v10 = vpack.c.bf16 %v1525_v33, %v1523_v32  ;;  %v1340_v11 = vpack.c.bf16 %v1542_v41, %v1534_v37  ;;  %v1352_v13 = vpack.c.bf16 %v138_v36, %v131_v35 }
  0x11   :  { %1263 = vmatmul.mubr.f32.vlgmr.msra.gmra.mrb[0].mxu1 %v122_v58  ;;  %1377 = vmatprep.subr.bf16.mxu1 %v1376_v62  ;;  %v1332_v2 = vpack.c.bf16 %v154_v63, %v147_v60  ;;  %v688_v3 = vand.u32 4294901760, %v687_v0  ;;  %v1388_v12 = vpack.c.bf16 %v687_v0, %v1573_v61  ;;  %v1400_v14 = vpack.c.bf16 %v674_v40, %v667_v39 }
  0x12   :  { %1331 = vmatpush3.bf16.msra.mxu0 %v1328_v59  ;;  %1379 = vmatpush3.bf16.msra.mxu1 %v1376_v62  ;;  %v682_v4 = vsub.f32 %v1573_v61, %v681_v1  ;;  %v1356_v15 = vpack.c.bf16 %v152_v49, %v145_v45 }
  0x13   :  { %1333 = vmatprep.subr.bf16.mxu0 %v1332_v2  ;;  %v689_v5 = vsub.f32 %v687_v0, %v688_v3  ;;  %1207 = vmatprep.mubr.f32.mxu0 %v1504_v25  ;;  %v1404_v17 = vpack.c.bf16 %v688_v3, %v681_v1 }
  0x14   :  { %v683_v7 = vand.u32 4294901760, %v682_v4  ;;  %1273 = vmatprep.mubr.f32.mxu1 %v1504_v25 }
  0x15   :  { %v690_v8 = vand.u32 4294901760, %v689_v5 }
  0x16   :  { %1335 = vmatpush3.bf16.msra.mxu0 %v1332_v2 }
  0x17   :  { %v1380_v9 = vpack.c.bf16 %v690_v8, %v683_v7  ;;  %1337 = vmatprep.subr.bf16.mxu0 %v1336_v6 }
  0x19   :  { %1381 = vmatprep.subr.bf16.mxu1 %v1380_v9  ;;  %1208 = vmatmul.mubr.f32.vlgmr.msra.gmra.mrb[0].mxu0 %v1509_v27 }
  0x1a   :  { %1383 = vmatpush3.bf16.msra.mxu1 %v1380_v9  ;;  %1339 = vmatpush3.bf16.msra.mxu0 %v1336_v6 }
  0x1b   :  { %1385 = vmatprep.subr.bf16.mxu1 %v1384_v10  ;;  %1341 = vmatprep.subr.bf16.mxu0 %v1340_v11 }
  0x1c   :  { %1218 = vmatprep.mubr.f32.mxu0 %v1521_v31 }
  0x1d   :  { %1274 = vmatmul.mubr.f32.vlgmr.msra.gmra.mrb[0].mxu1 %v1509_v27 }
  0x1e   :  { %1387 = vmatpush3.bf16.msra.mxu1 %v1384_v10  ;;  %1343 = vmatpush3.bf16.msra.mxu0 %v1340_v11 }
  0x1f   :  { %1389 = vmatprep.subr.bf16.mxu1 %v1388_v12  ;;  %1284 = vmatprep.mubr.f32.mxu1 %v1521_v31 }
  0x20   :  { %1345 = vmatprep.subr.bf16.mxu0 %v1490_v16 }
  0x21   :  { %1219 = vmatmul.mubr.f32.vlgmr.msra.gmra.mrb[0].mxu0 %v1530_v34 }
  0x22   :  { %1391 = vmatpush3.bf16.msra.mxu1 %v1388_v12  ;;  %1347 = vmatpush3.bf16.msra.mxu0 %v1490_v16 }
  0x23   :  { %1393 = vmatprep.subr.bf16.mxu1 %v1499_v22  ;;  %1349 = vmatprep.subr.bf16.mxu0 %v1501_v23 }
  0x24   :  { %1229 = vmatprep.mubr.f32.mxu0 %v1538_v38 }
  0x25   :  { %1285 = vmatmul.mubr.f32.vlgmr.msra.gmra.mrb[0].mxu1 %v1530_v34 }
  0x26   :  { %1395 = vmatpush3.bf16.msra.mxu1 %v1499_v22  ;;  %1351 = vmatpush3.bf16.msra.mxu0 %v1501_v23 }
  0x27   :  { %1397 = vmatprep.subr.bf16.mxu1 %v1507_v26  ;;  %1295 = vmatprep.mubr.f32.mxu1 %v1538_v38 }
  0x28   :  { %1353 = vmatprep.subr.bf16.mxu0 %v1352_v13 }
  0x29   :  { %1230 = vmatmul.mubr.f32.vlgmr.msra.gmra.mrb[0].mxu0 %v1545_v42 }
  0x2a   :  { %1399 = vmatpush3.bf16.msra.mxu1 %v1507_v26  ;;  %1355 = vmatpush3.bf16.msra.mxu0 %v1352_v13 }
  0x2b   :  { %1401 = vmatprep.subr.bf16.mxu1 %v1400_v14  ;;  %1357 = vmatprep.subr.bf16.mxu0 %v1356_v15 }
  0x2c   :  { %1240 = vmatprep.mubr.f32.mxu0 %v1504_v25 }
  0x2d   :  { %1296 = vmatmul.mubr.f32.vlgmr.msra.gmra.mrb[0].mxu1 %v1545_v42 }
  0x2e   :  { %1403 = vmatpush3.bf16.msra.mxu1 %v1400_v14  ;;  %1359 = vmatpush3.bf16.msra.mxu0 %v1356_v15 }
  0x2f   :  { %1405 = vmatprep.subr.bf16.mxu1 %v1404_v17  ;;  %1306 = vmatprep.mubr.f32.mxu1 %v1504_v25 }
  0x30   :  { %1361 = vmatprep.subr.bf16.mxu0 %v1490_v16 }
  0x31   :  { %1241 = vmatmul.mubr.f32.vlgmr.msra.gmra.mrb[0].mxu0 %v1509_v27 }
  0x32   :  { %1407 = vmatpush3.bf16.msra.mxu1 %v1404_v17  ;;  %1363 = vmatpush3.bf16.msra.mxu0 %v1490_v16 }
  0x33   :  { %1409 = vmatprep.subr.bf16.mxu1 %v1499_v22  ;;  %1365 = vmatprep.subr.bf16.mxu0 %v1501_v23 }
  0x34   :  { %1251 = vmatprep.mubr.f32.mxu0 %v1504_v25 }
  0x35   :  { %1307 = vmatmul.mubr.f32.vlgmr.msra.gmra.mrb[0].mxu1 %v1509_v27 }
  0x36   :  { %1411 = vmatpush3.bf16.msra.mxu1 %v1499_v22  ;;  %1367 = vmatpush3.bf16.msra.mxu0 %v1501_v23 }
  0x37   :  { %1413 = vmatprep.subr.bf16.mxu1 %v1507_v26  ;;  %1317 = vmatprep.mubr.f32.mxu1 %v1504_v25 }
  0x39   :  { %1252 = vmatmul.mubr.f32.vlgmr.msra.gmra.mrb[0].mxu0 %v1509_v27 }
  0x3a   :  { %1415 = vmatpush3.bf16.msra.mxu1 %v1507_v26 }
  0x3d   :  { %1318 = vmatmul.mubr.f32.vlgmr.msra.gmra.mrb[0].mxu1 %v1509_v27 }
  0x84   :  { %v25_v16 = vpop.permute.xlu0 %24 }
  0x88   :  { %v30_v18 = vpop.permute.xlu0 %29 }
 0x10c   :  { %v1253_v19 = vpop.f32.mrb[0].mxu0 }
 0x10d   :  { %v1416_v20 = vadd.f32 %v1253_v19, %v30_v18  ;;  %v557_v21 = vpop.f32.mrb[1].mxu0 }
 0x10e   :  { %v1417_v24 = vadd.f32 %v557_v21, %v25_v16 }
 0x10f   :  { %569 = vst.msk [vmem:[%s1647_s3 + $0x8] sm:$0xff] %vm567_vm1, %v1416_v20 }
 0x110   :  { %v1319_v22 = vpop.f32.mrb[0].mxu1  ;;  %568 = vst.msk [vmem:[%s1647_s3] sm:$0xff] %vm567_vm1, %v1417_v24 }
 0x111   :  { %v1418_v23 = vadd.f32 %v1319_v22, %v30_v18  ;;  %v1093_v25 = vpop.f32.mrb[1].mxu1 }
 0x112   :  { %v1419_v26 = vadd.f32 %v1093_v25, %v25_v16 }
 0x113   :  { %1115 = vst.msk [vmem:[%s1647_s3 + $0x18] sm:$0xff] %vm567_vm1, %v1418_v23 }
 0x114   :  { %1114 = vst.msk [vmem:[%s1647_s3 + $0x10] sm:$0xff] %vm567_vm1, %v1419_v26 }

</bundles_post_ra>
